<compile_context>
chip_gen: v7x
topology: tpu7x:2x2x1
jax: 0.10.0
libtpu: 0.0.40
codegen_flags: <defaults>
</compile_context>

<pallas_src>
import math

import jax
import jax.numpy as jnp
from jax.experimental import pallas as pl
from jax.experimental.pallas import tpu as pltpu


def _transpose_kernel(x_ref, o_ref):
    # x_ref tile: (TT, TC) ; o_ref tile: (TC, TT)  (batch dim squeezed away).
    o_ref[...] = x_ref[...].T


def _round_tile(dim: int, target: int) -> int:
    """Largest legal tile <= target along one axis.

    Legal means: equal to the full dim, or a multiple of 128 (covers both the
    lane requirement of whichever array has this axis last and the sublane
    requirement of the other array). No exact-divisor search: one ragged edge
    tile is cheaper than shrinking every tile.
    """
    if dim <= target:
        return dim
    return max((target // 128) * 128, 128)


def _pick_tiles(T: int, C: int, itemsize: int, tile_bytes: int):
    """Byte-sized tiles (~tile_bytes each), preferring one full-extent axis so
    one side of the transpose is a single contiguous HBM region per tile."""
    tile_elems = max(tile_bytes // itemsize, 128 * 128)
    full_axis_cap = 2048  # typical transformer hidden sizes
    if C <= full_axis_cap and C * 128 <= tile_elems:
        # Full-extent channel axis: contiguous input reads, lane-dense output.
        tc = C
        tt = _round_tile(T, max(tile_elems // C, 128))
    elif T <= full_axis_cap and T * 128 <= tile_elems:
        # Symmetric case: full-extent time axis.
        tt = T
        tc = _round_tile(C, max(tile_elems // T, 128))
    else:
        side = max((math.isqrt(tile_elems) // 128) * 128, 128)
        tt = _round_tile(T, side)
        tc = _round_tile(C, side)
    return tt, tc


def _vmem_budget_bytes() -> int:
    """3/4 of physical VMEM per TensorCore (generation-aware, v7x-safe fallback)."""
    try:
        phys = int(pltpu.get_tpu_info().vmem_capacity_bytes)
    except Exception:
        phys = 64 * 1024 * 1024  # v7x per-TC physical VMEM (most conservative)
    return (phys * 3) // 4


def transposer_forward(
    x: jax.Array,
    *,
    tile_bytes: int = 4 * 1024 * 1024,
    fast_path_slice_bytes: int = 4 * 1024 * 1024,
    in_buffers: int = 3,
) -> jax.Array:
    """Equivalent of torch `x.transpose(1, 2)` for a 3-D input [B, T, C]."""
    assert x.ndim == 3, "Transposer kernel expects a 3-D [B, T, C] input"
    B, T, C = x.shape
    itemsize = jnp.dtype(x.dtype).itemsize
    slice_bytes = T * C * itemsize

    budget = _vmem_budget_bytes()
    headroom = 8 * 1024 * 1024  # compiler scratch / misc

    # Clamp the user targets so the chosen configuration always fits VMEM.
    fast_bytes = min(fast_path_slice_bytes, (budget - headroom) // 4)
    n_in_bufs_tiled = max(2, in_buffers)
    tile_bytes_eff = min(tile_bytes, (budget - headroom) // (n_in_bufs_tiled + 2))

    if slice_bytes <= fast_bytes:
        # ---- Fast path: whole per-batch slice, fully contiguous DMAs. ----
        tt, tc = T, C
        n_in_bufs = 2
        grid = (B,)
        in_spec = pl.BlockSpec((None, T, C), lambda b: (b, 0, 0))
        out_spec = pl.BlockSpec((None, C, T), lambda b: (b, 0, 0))
    else:
        # ---- Tiled path: constant-VMEM byte-sized tiles. ----
        tt, tc = _pick_tiles(T, C, itemsize, tile_bytes_eff)
        n_in_bufs = n_in_bufs_tiled
        in_kwargs = {}
        if n_in_bufs != 2:
            # Deeper input pipelining: compute is negligible, so an extra input
            # buffer hides jitter on the strided-read side.
            in_kwargs["pipeline_mode"] = pl.Buffered(n_in_bufs)
        if B > 1:
            # Innermost axis advances the output's last-dim offset -> output
            # writeback streams contiguously. All axes parallel for megacore.
            grid = (B, pl.cdiv(C, tc), pl.cdiv(T, tt))
            in_spec = pl.BlockSpec(
                (None, tt, tc), lambda b, c, t: (b, t, c), **in_kwargs
            )
            out_spec = pl.BlockSpec((None, tc, tt), lambda b, c, t: (b, c, t))
        else:
            # B == 1: fold the batch dim into the block index so the large
            # tiled axes are the ones a v7x megacore split lands on.
            grid = (pl.cdiv(C, tc), pl.cdiv(T, tt))
            in_spec = pl.BlockSpec(
                (None, tt, tc), lambda c, t: (0, t, c), **in_kwargs
            )
            out_spec = pl.BlockSpec((None, tc, tt), lambda c, t: (0, c, t))

    tile_buf_bytes = tt * tc * itemsize
    needed = (n_in_bufs + 2) * tile_buf_bytes
    vmem_limit = min(max(32 * 1024 * 1024, needed + headroom), budget)

    bytes_accessed = 2 * B * T * C * itemsize

    return pl.pallas_call(
        _transpose_kernel,
        out_shape=jax.ShapeDtypeStruct((B, C, T), x.dtype),
        grid=grid,
        in_specs=[in_spec],
        out_specs=out_spec,
        compiler_params=pltpu.CompilerParams(
            dimension_semantics=("parallel",) * len(grid),
            vmem_limit_bytes=vmem_limit,
        ),
        cost_estimate=pl.CostEstimate(
            flops=0, transcendentals=0, bytes_accessed=bytes_accessed
        ),
    )(x)


if __name__ == "__main__":
    key = jax.random.PRNGKey(0)
    k0, k1, k2, k3, k4 = jax.random.split(key, 5)

    # 1) Small shape consistent with the module ([batch, seq, hidden]):
    #    exercises the full-slice fast path (contiguous DMAs, T < 128 safe).
    B, T, C = 2, 8, 32
    x = jax.random.normal(k0, (B, T, C), dtype=jnp.float32)
    out = jax.block_until_ready(transposer_forward(x))
    assert out.shape == (B, C, T), out.shape
    assert out.dtype == x.dtype
    assert jnp.array_equal(out, jnp.swapaxes(x, 1, 2)), "mismatch (fast path)"

    # 2) Generic 2-D tiled path (budgets forced small so the test stays tiny):
    #    multi-tile grid, Buffered(3) input pipeline, exact tiling.
    x2 = jax.random.normal(k1, (2, 256, 384), dtype=jnp.float32)
    out2 = jax.block_until_ready(
        transposer_forward(x2, tile_bytes=128 * 128 * 4, fast_path_slice_bytes=0)
    )
    assert jnp.array_equal(out2, jnp.swapaxes(x2, 1, 2)), "mismatch (tiled)"

    # 3) Ragged-edge tiles on both axes + B == 1 (2-axis grid, batch folded).
    x3 = jax.random.normal(k2, (1, 200, 160), dtype=jnp.float32)
    out3 = jax.block_until_ready(
        transposer_forward(x3, tile_bytes=128 * 128 * 4, fast_path_slice_bytes=0)
    )
    assert jnp.array_equal(out3, jnp.swapaxes(x3, 1, 2)), "mismatch (ragged)"

    # 4) Full-extent-C branch (contiguous per-tile input reads), ragged T edge.
    x4 = jax.random.normal(k3, (2, 300, 128), dtype=jnp.float32)
    out4 = jax.block_until_ready(
        transposer_forward(x4, tile_bytes=256 * 128 * 4, fast_path_slice_bytes=0)
    )
    assert jnp.array_equal(out4, jnp.swapaxes(x4, 1, 2)), "mismatch (full-extent C)"

    # 5) bf16: dtype preserved, exact permutation (byte-aware tiling kicks in
    #    automatically for packed dtypes at large shapes).
    x5 = jax.random.normal(k4, (2, 64, 96), dtype=jnp.bfloat16)
    out5 = jax.block_until_ready(transposer_forward(x5))
    assert out5.dtype == jnp.bfloat16
    assert jnp.array_equal(out5, jnp.swapaxes(x5, 1, 2)), "mismatch (bf16)"

    print("KERNEL_OK")
</pallas_src>

<mosaic_0001>
module attributes {stable_mosaic.version = 11 : i64} {
  func.func @_transpose_kernel(%arg0: i32, %arg1: memref<1x8x32xf32, #tpu.memory_space<vmem>>, %arg2: memref<1x32x8xf32, #tpu.memory_space<vmem>>) attributes {dimension_semantics = [#tpu.dimension_semantics<parallel>], iteration_bounds = array<i64: 2>, scalar_prefetch = 0 : i64, scratch_operands = 0 : i64, tpu.core_type = #tpu.core_type<tc>, window_params = [{transform_indices = @transform_0, window_bounds = array<i64: 1, 8, 32>}, {transform_indices = @transform_1, window_bounds = array<i64: 1, 32, 8>}]} {
    %c0 = arith.constant 0 : index
    %c0_0 = arith.constant 0 : index
    %c0_1 = arith.constant 0 : index
    %0 = vector.load %arg1[%c0, %c0_0, %c0_1] : memref<1x8x32xf32, #tpu.memory_space<vmem>>, vector<1x8x32xf32>
    %1 = vector.shape_cast %0 : vector<1x8x32xf32> to vector<8x32xf32>
    %2 = tpu.transpose %1, [1, 0] : vector<8x32xf32> -> vector<32x8xf32>
    %c0_2 = arith.constant 0 : index
    %c0_3 = arith.constant 0 : index
    %c0_4 = arith.constant 0 : index
    %3 = vector.load %arg2[%c0_2, %c0_3, %c0_4] : memref<1x32x8xf32, #tpu.memory_space<vmem>>, vector<1x32x8xf32>
    %4 = vector.shape_cast %3 : vector<1x32x8xf32> to vector<32x8xf32>
    %5 = vector.shape_cast %2 : vector<32x8xf32> to vector<1x32x8xf32>
    tpu.vector_store %arg2[%c0_2, %c0_3, %c0_4], %5 {strides = array<i32>} : memref<1x32x8xf32, #tpu.memory_space<vmem>>, vector<1x32x8xf32>,
    return
  }
  func.func @transform_0(%arg0: i32) -> (i32, i32, i32) {
    %c0_i32 = arith.constant 0 : i32
    %c0_i32_0 = arith.constant 0 : i32
    %c0_i32_1 = arith.constant 0 : i32
    return %arg0, %c0_i32, %c0_i32_0 : i32, i32, i32
  }
  func.func @transform_1(%arg0: i32) -> (i32, i32, i32) {
    %c0_i32 = arith.constant 0 : i32
    %c0_i32_0 = arith.constant 0 : i32
    %c0_i32_1 = arith.constant 0 : i32
    return %arg0, %c0_i32, %c0_i32_0 : i32, i32, i32
  }
}

</mosaic_0001>

<bundles_post_ra>
// kernel: tpu_custom_call.1
= control target key start
LH: loop header
LB: loop body
LE: loop exit
PB: predicated region body
PF: predicated region fallthrough
CT: control target
= control target key end

     0   :  { %6 = vsyncpa [#allocation3], 0  ;;  %s475_s0 = inlined_call_operand.hbm [shape: f32[2,8,32], index: 0, kind: input, shape index: {}]   ;;  %s476_s1 = inlined_call_operand.vmem [shape: f32[2,32,8], index: 1, kind: output, shape index: {}]  }
   0x1   :  { %8 = vsyncpa [#allocation3 + $0x1], 0  ;;  %s368_s6 = smov 0   ;;  %s370_s7 = smov 0  }
   0x2   :  { %s372_s8 = smov 0   ;;  %s374_s9 = smov 0  }
   0x3 LB: > { %s387_s10 = sadd.s32 4294967295, %s355_s9   ;;  %s390_s11 = sadd.s32 1, %s355_s9   ;;  %s355_s9 = sphi %s374_s9, %s484_s9   ;;  %s351_s8 = sphi %s372_s8, %s483_s8   ;;  %s347_s7 = sphi %s370_s7, %s482_s7   ;;  %s343_s6 = sphi %s368_s6, %s481_s6  }
   0x4   : > { %s18_s12 = ssub.s32 %s355_s9, %s390_s11  ;;  %s21_s13 = sadd.s32 1, %s351_s8 }
   0x5   : > { %p19_p0 = scmp.eq.s32.totalorder %s18_s12, 0  ;;  %p28_p1 = scmp.ne.s32.totalorder %s351_s8, %s347_s7 }
   0x6   : > { %p29_p2 = scmp.eq.s32.totalorder %s355_s9, 0  ;;  %p34_p3 = scmp.ne.s32.totalorder %s347_s7, %s343_s6 }
   0x7   : > { %s400_s14 = scalar_select %p19_p0, %s351_s8, %s21_s13  }
   0x8   : > { %p30_p4 = por %p29_p2, %p28_p1  ;;  %p35_p5 = scmp.eq.s32.totalorder %s387_s10, 0 }
   0x9   : > { %p257_p6 = scmp.lt.s32.totalorder %s355_s9, 2  ;;  %s84_s16 = sand.u32 1, %s351_s8  }
   0xa   : > { %p404_p7 = por %p35_p5, %p34_p3  ;;  %s242_s17 = sshll.u32 %s84_s16, 3 }
   0xb   : > { %s243_s18 = sshll.u32 %s355_s9, 7  ;;  %s88_s22 = scalar_lea.vmem [#allocation2], %s242_s17 }
   0xc   : > { %s413_s21 = scalar_lea.hbm %s475_s0, %s243_s18  ;;  %s95_s23 = sshll.u32 %s88_s22, 4  ;;  %s415_s23 = int_to_ptr.vmem [resolvable:$true] %s95_s23 }
   0xd   : > { %p417_p8 = pnand %p257_p6, %p30_p4  ;;  %s85_s25 = scalar_lea.sflag [#allocation3], %s84_s16 }
   0xe   : > { %s291_s26 = scalar_lea.hbm %s413_s21, 128  ;;  %s296_s29 = scalar_lea.hbm %s475_s0, 256 }
   0xf   : > { %p292_p11 = scmp.ne.s32.totalorder %s413_s21, %s291_s26  ;;  %p293_p12 = pneg %p417_p8 }
  0x10   : > { %p297_p1 = scmp.lt.u32.totalorder %s413_s21, %s475_s0  ;;  %p298_p2 = scmp.lt.u32.totalorder %s296_s29, %s291_s26 }
  0x11   : > { %p294_p13 = pnand %p293_p12, %p292_p11  ;;  %p300_p4 = scmp.lt.u32.totalorder %s291_s26, %s413_s21 }
  0x12   : > { %p299_p3 = por %p298_p2, %p297_p1 }
  0x13   : > { %p295_p0 = pneg %p294_p13 }
  0x14   : > { %p301_p5 = por %p300_p4, %p299_p3 }
  0x16   : > { %p302_p6 = pnand %p301_p5, %p295_p0 }
  0x18   : > { %305 = shalt.err (!%p302_p6)
}
  0x19   : > { %s306_s3 = scalar_lea.vmem %s415_s23, 128  ;;  %s357_s4 = smov [#allocation2]  }
  0x1a   : > { %p307_p11 = scmp.ne.s32.totalorder %s415_s23, %s306_s3  ;;  %s311_s5 = sshll.u32 %s357_s4, 4  ;;  %s312_s5 = int_to_ptr.vmem [resolvable:$false] %s311_s5 }
  0x1b   : > { %s313_s6 = scalar_lea.vmem %s312_s5, 256  ;;  %p314_p10 = scmp.lt.s32.totalorder %s415_s23, %s312_s5 }
  0x1c   : > { %p309_p13 = pnand %p307_p11, %p293_p12  ;;  %p315_p1 = scmp.lt.s32.totalorder %s313_s6, %s306_s3 }
  0x1e   : > { %p310_p9 = pneg %p309_p13  ;;  %p316_p2 = por %p315_p1, %p314_p10 }
  0x20   : > { %p317_p3 = pnand %p316_p2, %p310_p9 }
  0x22   : > { %320 = shalt.err (!%p317_p3)
}
  0x23   : > { %256 = dma.hbm_to_vmem [thread:$0]  (!%p417_p8), %s413_s21, 128, %s415_s23, %s85_s25  }
  0x24   : > { %p479_p0 = scmp.lt.s32.totalorder %s355_s9, 3  ;;  %p480_p4 = scmp.ge.s32.totalorder %s355_s9, 1 }
  0x26   : > { %p101_p12 = pnand %p480_p4, %p479_p0 }
  0x27   : > { %s106_s12 = sand.u32 (!%p101_p12), 1, %s347_s7  }
  0x28   : > { %104 = sbr.rel (%p101_p12) target bundleno = 191 (0xbf), region = 24  ;;  %s245_s13 = sshll.u32 (!%p101_p12), %s106_s12, 3 }
  0x29   : > { %s107_s16 = scalar_lea.sflag (!%p101_p12), [#allocation3], %s106_s12  ;;  %s110_s17 = scalar_lea.vmem (!%p101_p12), [#allocation2], %s245_s13 }
  0x2f   : > { %338 = dma.done.wait (%p404_p7), %s107_s16, 128  }
  0x30   : > { %340 = vsyncadd (%p404_p7), %s107_s16, 4294967168  ;;  %v134_v0 = vld [vmem:[%s110_s17] sm:$0xff]  ;;  %p129_p8 = scmp.lt.s32.totalorder %s387_s10, 1  ;;  %vm167_vm0 = vcmask 64512  }
  0x31   : > { %135 = vxpose.xlu0.b32.start.end [1/1] (short) (narrow) %v134_v0, 32 }
  0x32   : > { %s486_s10 = smov (!%p129_p8, %s387_s10), 1 }
  0x33   : > { %s250_s9 = sshll.u32 %s486_s10, 5 }
  0x34   : > { %s133_s20 = scalar_lea.vmem %s476_s1, %s250_s9 }
  0xb1   : > { %v151_v1 = vpop.trf.xlu0 }
  0xb2   : > { %168 = vst.msk [vmem:[%s133_s20] sm:$0xff] %vm167_vm0, %v151_v1 }
  0xb5   : > { %v152_v2 = vpop.trf.xlu0 }
  0xb6   : > { %169 = vst.msk [vmem:[%s133_s20 + $0x8] sm:$0xff] %vm167_vm0, %v152_v2 }
  0xb9   : > { %v153_v3 = vpop.trf.xlu0 }
  0xba   : > { %170 = vst.msk [vmem:[%s133_s20 + $0x10] sm:$0xff] %vm167_vm0, %v153_v3 }
  0xbd   : > { %v154_v4 = vpop.trf.xlu0 }
  0xbe   : > { %171 = vst.msk [vmem:[%s133_s20 + $0x18] sm:$0xff] %vm167_vm0, %v154_v4 }
  0xbf PF: > { %p11_p7 = scmp.ge.s32.totalorder %s390_s11, 4   ;;  %s481_s6 = smov %s347_s7 }
  0xc0   : > { %s482_s7 = smov %s351_s8  ;;  %s483_s8 = smov %s400_s14 }
  0xc1   : > { %s484_s9 = smov %s390_s11  ;;  %13 = sbr.rel (!%p11_p7) target bundleno = 3 (0x3), region = 64 }
  0xc8   :  { %193 = vsyncpa [#allocation3], 1 }
  0xc9   :  { %195 = vsyncpa [#allocation3 + $0x1], 1 }

</bundles_post_ra>
